<compile_context>
chip_gen: v7x
topology: tpu7x:2x2x1
jax: 0.10.0
libtpu: 0.0.40
codegen_flags: <defaults>
</compile_context>

<pallas_src>
import jax
import jax.numpy as jnp
from jax.experimental import pallas as pl
from jax.experimental.pallas import tpu as pltpu


def _graph_nonlocal_kernel(x_ref, mask_ref, w_proj_ref, b_proj_ref,
                           w_out_ref, b_out_ref, o_ref):
    x = x_ref[...]                                   # (Bb, N, C) float32
    bb, n, c = x.shape
    ci = w_out_ref.shape[0]

    # Fused theta|g|phi 1x1 convs: one (Bb*N, C) @ (C, 3*Ci) MXU matmul.
    x2 = x.reshape(bb * n, c)
    proj = jnp.dot(x2, w_proj_ref[...],
                   preferred_element_type=jnp.float32) + b_proj_ref[...]
    proj = proj.reshape(bb, n, 3 * ci)
    theta = proj[..., :ci]                           # (Bb, N, Ci), ORIGINAL node order
    gp = proj[..., ci:]                              # (Bb, N, 2*Ci) = [g | phi]

    # Node grouping + MaxPool1d(sub) fused into one masked max-reduction:
    # mask[j, k] == 1 iff original node k belongs to pooled group j.
    mask = mask_ref[...]                             # (Ns, N)
    sel = jnp.where(mask[None, :, :, None] != 0, gp[:, None, :, :], -jnp.inf)
    pooled = jnp.max(sel, axis=2)                    # (Bb, Ns, 2*Ci)
    g_p = pooled[..., :ci]                           # (Bb, Ns, Ci)
    phi_p = pooled[..., ci:]                         # (Bb, Ns, Ci)

    # Attention scores over pooled keys (contract last dims: no phi transpose),
    # softmax with approximate reciprocal (EUP), weighted sum of pooled g.
    f = jnp.einsum('bnk,bmk->bnm', theta, phi_p,
                   preferred_element_type=jnp.float32)          # (Bb, N, Ns)
    f = f - jnp.max(f, axis=-1, keepdims=True)
    e = jnp.exp(f)
    p = e * pl.reciprocal(jnp.sum(e, axis=-1, keepdims=True), approx=True)
    y = jnp.einsum('bnm,bmk->bnk', p, g_p,
                   preferred_element_type=jnp.float32)          # (Bb, N, Ci)

    # Output 1x1 conv with eval-mode BN pre-folded into weight/bias, then residual
    # with x (already in original node order -> no restore gather needed).
    wy = jnp.dot(y.reshape(bb * n, ci), w_out_ref[...],
                 preferred_element_type=jnp.float32) + b_out_ref[...]
    o_ref[...] = (wy.reshape(bb, n, c) + x).astype(o_ref.dtype)


def fuse_params(params, grouped_order, group_size, num_nodes):
    """Fold the module parameters into the fused form the kernel consumes."""
    n = num_nodes
    assert n % group_size == 0, "MaxPool requires N % group_size == 0"
    ns = n // group_size

    # Fused projection: [theta | g | phi].
    w_proj = jnp.concatenate([params["wt"], params["wg"], params["wp"]], axis=1)
    b_proj = jnp.concatenate([params["bt"], params["bg"], params["bp"]], axis=1)

    # Fold eval-mode BN into the output conv (exact algebraic fold).
    w_out = params["ww"] * params["bn_scale"]                     # (Ci, C)
    b_out = params["bw"] * params["bn_scale"] + params["bn_shift"]  # (1, C)

    # Group-membership mask: node k sits at grouped position restored_order[k],
    # hence in pooled group restored_order[k] // group_size.
    restored_order = jnp.argsort(jnp.asarray(grouped_order))
    group_of = restored_order // group_size                       # (N,)
    pool_mask = (group_of[None, :] == jnp.arange(ns)[:, None]).astype(jnp.float32)

    return {"w_proj": w_proj, "b_proj": b_proj,
            "w_out": w_out, "b_out": b_out, "pool_mask": pool_mask}


def _pick_batch_block(batch):
    """v5e/v6e have a single TensorCore -> fold the whole batch into one kernel
    step (no per-step grid overhead).  v7x (2 TCs/chip) and unknown chips keep the
    batch as a parallel grid axis."""
    try:
        kind = jax.devices()[0].device_kind.lower()
    except Exception:
        return 1
    if "v5" in kind or "v6" in kind:
        return batch
    return 1


def graph_non_local_forward(x, fused, *, batch_block=None):
    """x: (B, N, C) float32 in ORIGINAL node order.  Returns (B, N, C)."""
    B, N, C = x.shape
    Ci = fused["w_out"].shape[0]
    Ns = fused["pool_mask"].shape[0]

    if batch_block is None:
        batch_block = _pick_batch_block(B)
    assert B % batch_block == 0
    grid = (B // batch_block,)

    return pl.pallas_call(
        _graph_nonlocal_kernel,
        out_shape=jax.ShapeDtypeStruct((B, N, C), x.dtype),
        grid=grid,
        in_specs=[
            pl.BlockSpec((batch_block, N, C), lambda b: (b, 0, 0)),  # x
            pl.BlockSpec((Ns, N), lambda b: (0, 0)),                 # pool mask
            pl.BlockSpec((C, 3 * Ci), lambda b: (0, 0)),             # fused proj W
            pl.BlockSpec((1, 3 * Ci), lambda b: (0, 0)),             # fused proj b
            pl.BlockSpec((Ci, C), lambda b: (0, 0)),                 # out W (BN folded)
            pl.BlockSpec((1, C), lambda b: (0, 0)),                  # out b (BN folded)
        ],
        out_specs=pl.BlockSpec((batch_block, N, C), lambda b: (b, 0, 0)),
        compiler_params=pltpu.CompilerParams(dimension_semantics=("parallel",)),
    )(x, fused["pool_mask"], fused["w_proj"], fused["b_proj"],
      fused["w_out"], fused["b_out"])


def reference_forward(x, params, grouped_order, restored_order, sub):
    """Pure-JAX reference mirroring the PyTorch forward."""
    xg = x[:, grouped_order, :]
    theta = jnp.einsum('bnc,ck->bnk', xg, params["wt"]) + params["bt"]
    g = jnp.einsum('bnc,ck->bnk', xg, params["wg"]) + params["bg"]
    phi = jnp.einsum('bnc,ck->bnk', xg, params["wp"]) + params["bp"]
    B, N, Ci = g.shape
    g_p = jnp.max(g.reshape(B, N // sub, sub, Ci), axis=2)
    phi_p = jnp.max(phi.reshape(B, N // sub, sub, Ci), axis=2)
    f = jnp.einsum('bnk,bmk->bnm', theta, phi_p)
    p = jax.nn.softmax(f, axis=-1)
    y = jnp.einsum('bnm,bmk->bnk', p, g_p)
    wy = jnp.einsum('bnk,kc->bnc', y, params["ww"]) + params["bw"]
    wy = wy * params["bn_scale"] + params["bn_shift"]
    z = wy + xg
    return z[:, restored_order, :]


if __name__ == "__main__":
    # Small shapes consistent with the module: B batches, N graph nodes,
    # hid_dim channels (inter = hid_dim // 2), group_size divides N.
    B, N, C = 2, 16, 32
    Ci = C // 2
    group_size = 4

    key = jax.random.PRNGKey(0)
    keys = jax.random.split(key, 12)

    x = jax.random.normal(keys[0], (B, N, C), dtype=jnp.float32)

    # Deterministic node grouping: a permutation and its inverse.
    grouped_order = jax.random.permutation(keys[1], N)
    restored_order = jnp.argsort(grouped_order)

    # Deterministic synthetic parameters (1x1 conv weights stored as (in, out)).
    # NOTE: PyTorch __init__ zero-inits the BN gamma/beta (identity block at init);
    # here gamma/beta are random so the non-local path is actually exercised.
    # Running stats are the defaults (mean=0, var=1), eval mode.
    s = 0.1
    params = {
        "wg": s * jax.random.normal(keys[2], (C, Ci), dtype=jnp.float32),
        "bg": s * jax.random.normal(keys[3], (1, Ci), dtype=jnp.float32),
        "wt": s * jax.random.normal(keys[4], (C, Ci), dtype=jnp.float32),
        "bt": s * jax.random.normal(keys[5], (1, Ci), dtype=jnp.float32),
        "wp": s * jax.random.normal(keys[6], (C, Ci), dtype=jnp.float32),
        "bp": s * jax.random.normal(keys[7], (1, Ci), dtype=jnp.float32),
        "ww": s * jax.random.normal(keys[8], (Ci, C), dtype=jnp.float32),
        "bw": s * jax.random.normal(keys[9], (1, C), dtype=jnp.float32),
    }
    gamma = jax.random.normal(keys[10], (1, C), dtype=jnp.float32)
    beta = jax.random.normal(keys[11], (1, C), dtype=jnp.float32)
    running_mean = jnp.zeros((1, C), dtype=jnp.float32)
    running_var = jnp.ones((1, C), dtype=jnp.float32)
    eps = 1e-5
    params["bn_scale"] = gamma / jnp.sqrt(running_var + eps)
    params["bn_shift"] = beta - running_mean * params["bn_scale"]

    # One-time parameter fusion (projection fuse, BN fold, pooling mask).
    fused = fuse_params(params, grouped_order, group_size, N)

    out = graph_non_local_forward(x, fused)
    out = jax.block_until_ready(out)

    ref = reference_forward(x, params, grouped_order, restored_order, group_size)
    assert out.shape == (B, N, C)
    # Tolerance loosened slightly for pl.reciprocal(approx=True) in the softmax.
    assert jnp.allclose(out, ref, atol=5e-3, rtol=5e-3), "mismatch vs pure-JAX reference"

    print("KERNEL_OK")
</pallas_src>

<mosaic_0001>
module attributes {stable_mosaic.version = 11 : i64} {
  func.func @_graph_nonlocal_kernel(%arg0: i32, %arg1: memref<1x16x32xf32, #tpu.memory_space<vmem>>, %arg2: memref<4x16xf32, #tpu.memory_space<vmem>>, %arg3: memref<32x48xf32, #tpu.memory_space<vmem>>, %arg4: memref<1x48xf32, #tpu.memory_space<vmem>>, %arg5: memref<16x32xf32, #tpu.memory_space<vmem>>, %arg6: memref<1x32xf32, #tpu.memory_space<vmem>>, %arg7: memref<1x16x32xf32, #tpu.memory_space<vmem>>) attributes {dimension_semantics = [#tpu.dimension_semantics<parallel>], iteration_bounds = array<i64: 2>, scalar_prefetch = 0 : i64, scratch_operands = 0 : i64, tpu.core_type = #tpu.core_type<tc>, window_params = [{transform_indices = @transform_0, window_bounds = array<i64: 1, 16, 32>}, {pipeline_mode = #tpu.pipeline_mode<synchronous>, transform_indices = @transform_1, window_bounds = array<i64: 4, 16>}, {pipeline_mode = #tpu.pipeline_mode<synchronous>, transform_indices = @transform_2, window_bounds = array<i64: 32, 48>}, {pipeline_mode = #tpu.pipeline_mode<synchronous>, transform_indices = @transform_3, window_bounds = array<i64: 1, 48>}, {pipeline_mode = #tpu.pipeline_mode<synchronous>, transform_indices = @transform_4, window_bounds = array<i64: 16, 32>}, {pipeline_mode = #tpu.pipeline_mode<synchronous>, transform_indices = @transform_5, window_bounds = array<i64: 1, 32>}, {transform_indices = @transform_6, window_bounds = array<i64: 1, 16, 32>}]} {
    %c0 = arith.constant 0 : index
    %c0_0 = arith.constant 0 : index
    %c0_1 = arith.constant 0 : index
    %0 = vector.load %arg1[%c0, %c0_0, %c0_1] : memref<1x16x32xf32, #tpu.memory_space<vmem>>, vector<1x16x32xf32>
    %1 = vector.shape_cast %0 : vector<1x16x32xf32> to vector<16x32xf32>
    %c0_2 = arith.constant 0 : index
    %c0_3 = arith.constant 0 : index
    %2 = vector.load %arg3[%c0_2, %c0_3] : memref<32x48xf32, #tpu.memory_space<vmem>>, vector<32x48xf32>
    %cst = arith.constant dense<0.000000e+00> : vector<16x48xf32>
    %3 = tpu.matmul %1, %2, %cst {dimension_numbers = #tpu.dot_dimension_numbers<[1], [0], [0], [1], [0, 0, 1, 1], [], []>} : vector<16x32xf32>, vector<32x48xf32>, vector<16x48xf32> -> vector<16x48xf32>
    %c0_4 = arith.constant 0 : index
    %c0_5 = arith.constant 0 : index
    %4 = vector.load %arg4[%c0_4, %c0_5] : memref<1x48xf32, #tpu.memory_space<vmem>>, vector<1x48xf32>
    %5 = vector.broadcast %4 : vector<1x48xf32> to vector<16x48xf32>
    %6 = arith.addf %3, %5 : vector<16x48xf32>
    %7 = vector.shape_cast %6 : vector<16x48xf32> to vector<1x16x48xf32>
    %8 = vector.extract_strided_slice %7 {offsets = [0, 0, 0], sizes = [1, 16, 16], strides = [1, 1, 1]} : vector<1x16x48xf32> to vector<1x16x16xf32>
    %9 = vector.extract_strided_slice %7 {offsets = [0, 0, 16], sizes = [1, 16, 32], strides = [1, 1, 1]} : vector<1x16x48xf32> to vector<1x16x32xf32>
    %c0_6 = arith.constant 0 : index
    %c0_7 = arith.constant 0 : index
    %10 = vector.load %arg2[%c0_6, %c0_7] : memref<4x16xf32, #tpu.memory_space<vmem>>, vector<4x16xf32>
    %11 = vector.shape_cast %10 : vector<4x16xf32> to vector<1x4x16x1xf32>
    %cst_8 = arith.constant 0.000000e+00 : f32
    %12 = vector.broadcast %cst_8 : f32 to vector<1x4x16x1xf32>
    %13 = arith.cmpf one, %11, %12 : vector<1x4x16x1xf32>
    %14 = vector.shape_cast %9 : vector<1x16x32xf32> to vector<1x1x16x32xf32>
    %cst_9 = arith.constant 0xFF800000 : f32
    %15 = vector.shape_cast %13 : vector<1x4x16x1xi1> to vector<1x4x16x1xi1>
    %16 = vector.broadcast %15 : vector<1x4x16x1xi1> to vector<1x4x16x32xi1>
    %17 = vector.shape_cast %14 : vector<1x1x16x32xf32> to vector<1x1x16x32xf32>
    %18 = vector.broadcast %17 : vector<1x1x16x32xf32> to vector<1x4x16x32xf32>
    %19 = vector.broadcast %cst_9 : f32 to vector<1x4x16x32xf32>
    %20 = arith.select %16, %18, %19 : vector<1x4x16x32xi1>, vector<1x4x16x32xf32>
    %cst_10 = arith.constant dense<0xFF800000> : vector<1x4x32xf32>
    %21 = vector.multi_reduction <maximumf>, %20, %cst_10 [2] : vector<1x4x16x32xf32> to vector<1x4x32xf32>
    %22 = vector.extract_strided_slice %21 {offsets = [0, 0, 0], sizes = [1, 4, 16], strides = [1, 1, 1]} : vector<1x4x32xf32> to vector<1x4x16xf32>
    %23 = vector.extract_strided_slice %21 {offsets = [0, 0, 16], sizes = [1, 4, 16], strides = [1, 1, 1]} : vector<1x4x32xf32> to vector<1x4x16xf32>
    "tpu.trace_start"() <{level = 10 : i32, message = "bnk,bmk->bnm"}> : () -> ()
    %cst_11 = arith.constant dense<0.000000e+00> : vector<1x16x4xf32>
    %24 = tpu.matmul %8, %23, %cst_11 {dimension_numbers = #tpu.dot_dimension_numbers<[2], [2], [1], [1], [0, 0, 0, 1, 1, 1], [0], [0]>} : vector<1x16x16xf32>, vector<1x4x16xf32>, vector<1x16x4xf32> -> vector<1x16x4xf32>
    "tpu.trace_stop"() : () -> ()
    %cst_12 = arith.constant dense<0xFF800000> : vector<1x16xf32>
    %25 = vector.multi_reduction <maximumf>, %24, %cst_12 [2] : vector<1x16x4xf32> to vector<1x16xf32>
    %26 = vector.shape_cast %25 : vector<1x16xf32> to vector<1x16x1xf32>
    %27 = vector.broadcast %26 : vector<1x16x1xf32> to vector<1x16x4xf32>
    %28 = arith.subf %24, %27 : vector<1x16x4xf32>
    %29 = math.exp %28 : vector<1x16x4xf32>
    %cst_13 = arith.constant dense<0.000000e+00> : vector<1x16xf32>
    %30 = vector.multi_reduction <add>, %29, %cst_13 [2] : vector<1x16x4xf32> to vector<1x16xf32>
    %31 = vector.shape_cast %30 : vector<1x16xf32> to vector<1x16x1xf32>
    %32 = tpu.reciprocal %31 {approx = true} : vector<1x16x1xf32> -> vector<1x16x1xf32>
    %33 = vector.broadcast %32 : vector<1x16x1xf32> to vector<1x16x4xf32>
    %34 = arith.mulf %29, %33 : vector<1x16x4xf32>
    "tpu.trace_start"() <{level = 10 : i32, message = "bnm,bmk->bnk"}> : () -> ()
    %cst_14 = arith.constant dense<0.000000e+00> : vector<1x16x16xf32>
    %35 = tpu.matmul %34, %22, %cst_14 {dimension_numbers = #tpu.dot_dimension_numbers<[2], [1], [1], [2], [0, 0, 0, 1, 1, 2], [0], [0]>} : vector<1x16x4xf32>, vector<1x4x16xf32>, vector<1x16x16xf32> -> vector<1x16x16xf32>
    "tpu.trace_stop"() : () -> ()
    %36 = vector.shape_cast %35 : vector<1x16x16xf32> to vector<16x16xf32>
    %c0_15 = arith.constant 0 : index
    %c0_16 = arith.constant 0 : index
    %37 = vector.load %arg5[%c0_15, %c0_16] : memref<16x32xf32, #tpu.memory_space<vmem>>, vector<16x32xf32>
    %cst_17 = arith.constant dense<0.000000e+00> : vector<16x32xf32>
    %38 = tpu.matmul %36, %37, %cst_17 {dimension_numbers = #tpu.dot_dimension_numbers<[1], [0], [0], [1], [0, 0, 1, 1], [], []>} : vector<16x16xf32>, vector<16x32xf32>, vector<16x32xf32> -> vector<16x32xf32>
    %c0_18 = arith.constant 0 : index
    %c0_19 = arith.constant 0 : index
    %39 = vector.load %arg6[%c0_18, %c0_19] : memref<1x32xf32, #tpu.memory_space<vmem>>, vector<1x32xf32>
    %40 = vector.broadcast %39 : vector<1x32xf32> to vector<16x32xf32>
    %41 = arith.addf %38, %40 : vector<16x32xf32>
    %42 = vector.shape_cast %41 : vector<16x32xf32> to vector<1x16x32xf32>
    %43 = arith.addf %42, %0 : vector<1x16x32xf32>
    %c0_20 = arith.constant 0 : index
    %c0_21 = arith.constant 0 : index
    %c0_22 = arith.constant 0 : index
    %44 = vector.load %arg7[%c0_20, %c0_21, %c0_22] : memref<1x16x32xf32, #tpu.memory_space<vmem>>, vector<1x16x32xf32>
    tpu.vector_store %arg7[%c0_20, %c0_21, %c0_22], %43 {strides = array<i32>} : memref<1x16x32xf32, #tpu.memory_space<vmem>>, vector<1x16x32xf32>,
    return
  }
  func.func @transform_0(%arg0: i32) -> (i32, i32, i32) {
    %c0_i32 = arith.constant 0 : i32
    %c0_i32_0 = arith.constant 0 : i32
    %c0_i32_1 = arith.constant 0 : i32
    return %arg0, %c0_i32, %c0_i32_0 : i32, i32, i32
  }
  func.func @transform_1(%arg0: i32) -> (i32, i32) {
    %c0_i32 = arith.constant 0 : i32
    %c0_i32_0 = arith.constant 0 : i32
    %c0_i32_1 = arith.constant 0 : i32
    return %c0_i32, %c0_i32_0 : i32, i32
  }
  func.func @transform_2(%arg0: i32) -> (i32, i32) {
    %c0_i32 = arith.constant 0 : i32
    %c0_i32_0 = arith.constant 0 : i32
    %c0_i32_1 = arith.constant 0 : i32
    return %c0_i32, %c0_i32_0 : i32, i32
  }
  func.func @transform_3(%arg0: i32) -> (i32, i32) {
    %c0_i32 = arith.constant 0 : i32
    %c0_i32_0 = arith.constant 0 : i32
    %c0_i32_1 = arith.constant 0 : i32
    return %c0_i32, %c0_i32_0 : i32, i32
  }
  func.func @transform_4(%arg0: i32) -> (i32, i32) {
    %c0_i32 = arith.constant 0 : i32
    %c0_i32_0 = arith.constant 0 : i32
    %c0_i32_1 = arith.constant 0 : i32
    return %c0_i32, %c0_i32_0 : i32, i32
  }
  func.func @transform_5(%arg0: i32) -> (i32, i32) {
    %c0_i32 = arith.constant 0 : i32
    %c0_i32_0 = arith.constant 0 : i32
    %c0_i32_1 = arith.constant 0 : i32
    return %c0_i32, %c0_i32_0 : i32, i32
  }
  func.func @transform_6(%arg0: i32) -> (i32, i32, i32) {
    %c0_i32 = arith.constant 0 : i32
    %c0_i32_0 = arith.constant 0 : i32
    %c0_i32_1 = arith.constant 0 : i32
    return %arg0, %c0_i32, %c0_i32_0 : i32, i32, i32
  }
}

</mosaic_0001>

<bundles_post_ra>
// kernel: tpu_custom_call.1
= control target key start
LH: loop header
LB: loop body
LE: loop exit
PB: predicated region body
PF: predicated region fallthrough
CT: control target
= control target key end

     0   :  { %11 = vsyncpa [#allocation3], 0  ;;  %s1659_s0 = inlined_call_operand.hbm [shape: f32[2,16,32], index: 0, kind: input, shape index: {}]   ;;  %s1660_s1 = inlined_call_operand.hbm [shape: f32[4,16], index: 1, kind: input, shape index: {}]   ;;  %s1661_s2 = inlined_call_operand.hbm [shape: f32[32,48], index: 2, kind: input, shape index: {}]   ;;  %s1662_s3 = inlined_call_operand.vmem [shape: f32[1,48], index: 3, kind: input, shape index: {}]   ;;  %s1663_s4 = inlined_call_operand.hbm [shape: f32[16,32], index: 4, kind: input, shape index: {}]   ;;  %s1664_s5 = inlined_call_operand.vmem [shape: f32[1,32], index: 5, kind: input, shape index: {}]   ;;  %s1665_s6 = inlined_call_operand.hbm [shape: f32[2,16,32], index: 6, kind: output, shape index: {}]  }
   0x1   :  { %13 = vsyncpa [#allocation3 + $0x1], 0 }
   0x2   :  { %14 = vsyncpa [#allocation6], 0 }
   0x3   :  { %15 = vsyncpa [#allocation9], 0 }
   0x4   :  { %16 = vsyncpa [#allocation4], 0 }
   0x5   :  { %18 = vsyncpa [#allocation4 + $0x1], 0  ;;  %s1353_s21 = smov 0   ;;  %s1355_s22 = smov 0  }
   0x6   :  { %s1357_s23 = smov 0   ;;  %s1359_s24 = smov 0  }
   0x7 LB: > { %s1374_s25 = sadd.s32 4294967295, %s1305_s24   ;;  %s936_s26 = sadd.s32 4294967294, %s1305_s24   ;;  %s1305_s24 = sphi %s1359_s24, %s1688_s24   ;;  %s1301_s23 = sphi %s1357_s23, %s1687_s23   ;;  %s1297_s22 = sphi %s1355_s22, %s1686_s22   ;;  %s1293_s21 = sphi %s1353_s21, %s1685_s21  }
   0x8   : > { %p44_p0 = scmp.ne.s32.totalorder %s1297_s22, %s1293_s21  ;;  %p1666_p1 = scmp.eq.s32.totalorder %s1374_s25, 0 }
   0x9   : > { %p179_p3 = scmp.eq.s32.totalorder %s936_s26, 1  ;;  %p937_p5 = scmp.ge.s32.totalorder %s1305_s24, 1 }
   0xa   : > { %p1383_p4 = por %p1666_p1, %p44_p0  ;;  %p186_p7 = scmp.lt.s32.totalorder %s1305_s24, 3 }
   0xb   : > { %p1388_p6 = por %p179_p3, %p44_p0  ;;  %s1307_s30 = smov [#allocation5]  }
   0xc   : > { %s1669_s27 = scalar_select %p1383_p4, 1, 0 }
   0xd   : > { %s1670_s28 = scalar_select %p1388_p6, 1, 0 }
   0xe   : > { %p1393_p8 = pnand %p937_p5, %p186_p7  ;;  %s199_s7 = sshll.u32 %s1307_s30, 4  ;;  %s200_s7 = int_to_ptr.vmem [resolvable:$true] %s199_s7 }
   0xf   : > { %s1308_s8 = smov [#allocation7]   ;;  %s1309_s11 = smov [#allocation8]  }
  0x10   : > { %s1671_s29 = scalar_select %p1393_p8, 1, 0 }
  0x11   : > { %p1042_p10 = pneg %p1393_p8  ;;  %s209_s9 = sshll.u32 %s1308_s8, 4  ;;  %s1406_s9 = int_to_ptr.vmem [resolvable:$true] %s209_s9 }
  0x12   : > { %s1408_s12 = sshll.u32 %s1309_s11, 4  ;;  %s1117_s15 = scalar_lea.hbm %s1660_s1, 64  ;;  %s226_s12 = int_to_ptr.vmem [resolvable:$true] %s1408_s12 }
  0x13   : > { %p1402_p11 = pnand %p1042_p10, %p1666_p1  ;;  %p1118_p12 = scmp.ne.s32.totalorder %s1660_s1, %s1117_s15 }
  0x14   : > { %p1124_p5 = scmp.lt.u32.totalorder %s1117_s15, %s1660_s1 }
  0x15   : > { %p1418_p13 = pneg %p1402_p11 }
  0x17   : > { %p1120_p0 = pnand %p1418_p13, %p1118_p12 }
  0x19   : > { %p1121_p3 = pneg %p1120_p0 }
  0x1b   : > { %p1126_p7 = pnand %p1124_p5, %p1121_p3 }
  0x1d   : > { %1129 = shalt.err (!%p1126_p7)
}
  0x1e   : > { %s1130_s26 = scalar_lea.vmem %s200_s7, 64  ;;  %p1138_p2 = scmp.lt.s32.totalorder %s200_s7, %s200_s7 }
  0x1f   : > { %p1131_p10 = scmp.ne.s32.totalorder %s200_s7, %s1130_s26  ;;  %p1139_p6 = scmp.lt.s32.totalorder %s1130_s26, %s1130_s26 }
  0x21   : > { %p1133_p9 = pnand %p1131_p10, %p1418_p13  ;;  %p1140_p4 = por %p1139_p6, %p1138_p2 }
  0x23   : > { %p1134_p1 = pneg %p1133_p9 }
  0x25   : > { %p1141_p8 = pnand %p1140_p4, %p1134_p1 }
  0x27   : > { %1144 = shalt.err (!%p1141_p8)
}
  0x28   : > { %1045 = dma.hbm_to_vmem [thread:$0]  (!%p1402_p11), %s1660_s1, 64, %s200_s7, [#allocation6]  }
  0x29   : > { %s1145_s14 = scalar_lea.hbm %s1661_s2, 512 }
  0x2a   : > { %p1146_p9 = scmp.ne.s32.totalorder %s1661_s2, %s1145_s14  ;;  %p1152_p1 = scmp.lt.u32.totalorder %s1145_s14, %s1661_s2 }
  0x2c   : > { %p1148_p12 = pnand %p1146_p9, %p1418_p13 }
  0x2e   : > { %p1149_p2 = pneg %p1148_p12 }
  0x30   : > { %p1154_p4 = pnand %p1152_p1, %p1149_p2 }
  0x32   : > { %1157 = shalt.err (!%p1154_p4)
}
  0x33   : > { %s1158_s7 = scalar_lea.vmem %s1406_s9, 512  ;;  %p1166_p3 = scmp.lt.s32.totalorder %s1406_s9, %s1406_s9 }
  0x34   : > { %p1159_p6 = scmp.ne.s32.totalorder %s1406_s9, %s1158_s7  ;;  %p1167_p5 = scmp.lt.s32.totalorder %s1158_s7, %s1158_s7 }
  0x36   : > { %p1161_p8 = pnand %p1159_p6, %p1418_p13  ;;  %p1168_p7 = por %p1167_p5, %p1166_p3 }
  0x38   : > { %p1162_p0 = pneg %p1161_p8 }
  0x3a   : > { %p1169_p10 = pnand %p1168_p7, %p1162_p0 }
  0x3c   : > { %1172 = shalt.err (!%p1169_p10)
}
  0x3d   : > { %s1310_s20 = smov 128   ;;  %s1311_s26 = smov 8  }
  0x3e   : > { %1048 = dma.hbm_to_vmem [thread:$0]  (!%p1402_p11), %s1661_s2, 512, %s1406_s9, [#allocation6], %s1310_s20, %s1310_s20, %s1311_s26  }
  0x3f   : > { %s1173_s14 = scalar_lea.hbm %s1663_s4, 256 }
  0x40   : > { %p1174_p9 = scmp.ne.s32.totalorder %s1663_s4, %s1173_s14  ;;  %p1180_p1 = scmp.lt.u32.totalorder %s1173_s14, %s1663_s4 }
  0x42   : > { %p1176_p12 = pnand %p1174_p9, %p1418_p13 }
  0x44   : > { %p1177_p2 = pneg %p1176_p12 }
  0x46   : > { %p1182_p4 = pnand %p1180_p1, %p1177_p2 }
  0x48   : > { %1185 = shalt.err (!%p1182_p4)
}
  0x49   : > { %s1186_s7 = scalar_lea.vmem %s226_s12, 256  ;;  %p1194_p3 = scmp.lt.s32.totalorder %s226_s12, %s226_s12 }
  0x4a   : > { %p1187_p6 = scmp.ne.s32.totalorder %s226_s12, %s1186_s7  ;;  %p1195_p5 = scmp.lt.s32.totalorder %s1186_s7, %s1186_s7 }
  0x4c   : > { %p1189_p8 = pnand %p1187_p6, %p1418_p13  ;;  %p1196_p7 = por %p1195_p5, %p1194_p3 }
  0x4e   : > { %p1190_p0 = pneg %p1189_p8 }
  0x50   : > { %p1197_p10 = pnand %p1196_p7, %p1190_p0 }
  0x52   : > { %1200 = shalt.err (!%p1197_p10)
}
  0x53   : > { %1051 = dma.hbm_to_vmem [thread:$0]  (!%p1402_p11), %s1663_s4, 256, %s226_s12, [#allocation9], %s1310_s20, %s1310_s20, %s1311_s26  }
  0x54   : > { %s1483_s18 = sadd.s32 1, %s1305_s24   ;;  %s31_s8 = sadd.s32 1, %s1301_s23 }
  0x55   : > { %s28_s10 = ssub.s32 %s1305_s24, %s1483_s18  ;;  %p38_p9 = scmp.ne.s32.totalorder %s1301_s23, %s1297_s22 }
  0x56   : > { %p29_p13 = scmp.eq.s32.totalorder %s28_s10, 0  ;;  %p39_p12 = scmp.eq.s32.totalorder %s1305_s24, 0 }
  0x57   : > { %p1063_p2 = scmp.lt.s32.totalorder %s1305_s24, 2  ;;  %p1674_p4 = scmp.eq.s32.totalorder %s1374_s25, 1 }
  0x58   : > { %s1493_s11 = scalar_select %p29_p13, %s1301_s23, %s31_s8  }
  0x59   : > { %p40_p1 = por %p39_p12, %p38_p9  ;;  %p1497_p6 = por %p1674_p4, %p38_p9 }
  0x5a   : > { %s242_s14 = sand.u32 1, %s1301_s23   ;;  %s968_s15 = sshll.u32 %s1305_s24, 8 }
  0x5b   : > { %s942_s12 = sshll.u32 %s242_s14, 4  ;;  %s1506_s19 = scalar_lea.hbm %s1659_s0, %s968_s15 }
  0x5c   : > { %s246_s7 = scalar_lea.vmem [#allocation2], %s942_s12  ;;  %p1508_p11 = pnand %p1063_p2, %p40_p1 }
  0x5d   : > { %s253_s9 = sshll.u32 %s246_s7, 4  ;;  %s1514_s10 = scalar_lea.sflag [#allocation3], %s242_s14  ;;  %s1512_s9 = int_to_ptr.vmem [resolvable:$true] %s253_s9 }
  0x5e   : > { %s1201_s8 = scalar_lea.hbm %s1506_s19, 256  ;;  %p1203_p0 = pneg %p1508_p11 }
  0x5f   : > { %p1202_p8 = scmp.ne.s32.totalorder %s1506_s19, %s1201_s8  ;;  %s1206_s16 = scalar_lea.hbm %s1659_s0, 512 }
  0x60   : > { %p1207_p7 = scmp.lt.u32.totalorder %s1506_s19, %s1659_s0  ;;  %p1208_p10 = scmp.lt.u32.totalorder %s1206_s16, %s1201_s8 }
  0x61   : > { %p1204_p3 = pnand %p1203_p0, %p1202_p8  ;;  %p1210_p9 = scmp.lt.u32.totalorder %s1201_s8, %s1506_s19 }
  0x62   : > { %p1209_p13 = por %p1208_p10, %p1207_p7 }
  0x63   : > { %p1205_p5 = pneg %p1204_p3 }
  0x64   : > { %p1211_p12 = por %p1210_p9, %p1209_p13 }
  0x66   : > { %p1212_p2 = pnand %p1211_p12, %p1205_p5 }
  0x68   : > { %1215 = shalt.err (!%p1212_p2)
}
  0x69   : > { %s1216_s14 = scalar_lea.vmem %s1512_s9, 256  ;;  %s1312_s15 = smov [#allocation2]  }
  0x6a   : > { %p1217_p1 = scmp.ne.s32.totalorder %s1512_s9, %s1216_s14  ;;  %s1221_s12 = sshll.u32 %s1312_s15, 4  ;;  %s1222_s12 = int_to_ptr.vmem [resolvable:$false] %s1221_s12 }
  0x6b   : > { %s1223_s17 = scalar_lea.vmem %s1222_s12, 512  ;;  %p1224_p3 = scmp.lt.s32.totalorder %s1512_s9, %s1222_s12 }
  0x6c   : > { %p1219_p4 = pnand %p1217_p1, %p1203_p0  ;;  %p1225_p7 = scmp.lt.s32.totalorder %s1223_s17, %s1216_s14 }
  0x6e   : > { %p1220_p8 = pneg %p1219_p4  ;;  %p1226_p10 = por %p1225_p7, %p1224_p3 }
  0x70   : > { %p1227_p13 = pnand %p1226_p10, %p1220_p8 }
  0x72   : > { %1230 = shalt.err (!%p1227_p13)
}
  0x73   : > { %1055 = dma.hbm_to_vmem [thread:$0]  (!%p1508_p11), %s1506_s19, 256, %s1512_s9, %s1514_s10, %s1310_s20, %s1310_s20, %s1311_s26  }
  0x74   : > { %p1677_p0 = scmp.ne.s32.totalorder %s1671_s29, 0 }
  0x75   : > { %s1548_s8 = sand.u32 (!%p1677_p0), 1, %s1297_s22   ;;  %p1678_p5 = scmp.ne.s32.totalorder (!%p1677_p0), %s1669_s27, 0 }
  0x76   : > { %265 = sbr.rel (%p1677_p0) target bundleno = 1474 (0x5c2), region = 44  ;;  %s946_s16 = sshll.u32 (!%p1677_p0), %s1548_s8, 4 }
  0x77   : > { %s268_s7 = scalar_lea.sflag (!%p1677_p0), [#allocation3], %s1548_s8  ;;  %s271_s30 = scalar_lea.vmem (!%p1677_p0), [#allocation2], %s946_s16 }
  0x7d   : > { %1276 = dma.done.wait (%p1678_p5), %s268_s7, 256  }
  0x7e   : > { %1278 = vsyncadd (%p1678_p5), %s268_s7, 4294967040  ;;  %p1679_p11 = scmp.eq.s32.totalorder %s1374_s25, 0 }
  0x80   : > { %1280 = dma.done.wait (%p1679_p11), [#allocation6], 576   ;;  %p1680_p9 = pmov %p1679_p11 }
  0x82   : > { %1282 = vsyncadd (%p1680_p9), [#allocation6], 4294966720  ;;  %p1681_p12 = pmov %p1680_p9 }
  0x83   : > { %p1682_p2 = pmov %p1680_p9 }
  0x84   : > { %1284 = dma.done.wait (%p1681_p12), [#allocation9], 256  }
  0x85   : > { %1286 = vsyncadd (%p1682_p2), [#allocation9], 4294967040  ;;  %v408_v0 = vlaneseq  ;;  %vm325_vm0 = vcmask 261120   ;;  %v314_v4 = vld [vmem:[#allocation7] sm:$0xff]  ;;  %v315_v5 = vld [vmem:[#allocation7 + $0x8] sm:$0xff]  ;;  %vm484_vm2 = vcmask 392320  }
  0x86   : > { %v316_v6 = vld [vmem:[#allocation7 + $0x10] sm:$0xff]  ;;  %v1014_v7 = vpack.c.bf16 %v315_v5, %v314_v4  ;;  %v317_v8 = vld [vmem:[#allocation7 + $0x18] sm:$0xff]  ;;  %vm533_vm4 = vcmask 130048   ;;  %vm525_vm11 = vcmask 1041409   ;;  %vm527_vm12 = vcmask 1042434   ;;  %s1313_s20 = smov 96  }
  0x87   : > { %v409_v1 = vshrl.u32 %v408_v0, 7  ;;  %v1566_v9 = vld [vmem:[%s271_s30] sm:$0xff]  ;;  %v1018_v10 = vpack.c.bf16 %v317_v8, %v316_v6  ;;  %v1570_v15 = vld [vmem:[%s271_s30 + $0x8] sm:$0xff]  ;;  %vm529_vm13 = vcmask 1043459   ;;  %vm617_vm14 = vcmask 31744   ;;  %s1314_s26 = smov 112  }
  0x88   : > { %994 = vmatprep.mubr.msk.f32.mxu0 %vm325_vm0, %v1566_v9  ;;  %v407_v11 = vld [vmem:[#allocation5] sm:$0xf]  ;;  %1015 = vmatprep.subr.bf16.mxu0 %v1014_v7  ;;  %vm648_vm15 = vcmask 1043456   ;;  %s969_s10 = sshll.u32 %s1374_s25, 8  ;;  %s311_s14 = scalar_lea.vmem [#allocation10], %s946_s16 }
  0x89   : > { %v421_v2 = vsub.s32 1, %v409_v1  ;;  %v410_v3 = vsub.s32 0, %v409_v1  ;;  %1017 = vmatpush3.bf16.msra.mxu0 %v1014_v7  ;;  %v432_v14 = vsub.s32 2, %v409_v1  ;;  %v443_v17 = vsub.s32 3, %v409_v1  ;;  %v951_v26 = vld [vmem:[%s1662_s3] ss:$0 sm:$0xff]  ;;  %s1610_s7 = scalar_lea.hbm %s1665_s6, %s969_s10 }
  0x8a   : > { %1019 = vmatprep.subr.bf16.mxu0 %v1018_v10  ;;  %s834_s15 = sshll.u32 %s311_s14, 4  ;;  %s821_s25 = scalar_lea.sflag [#allocation4], %s1548_s8  ;;  %s1612_s15 = int_to_ptr.vmem [resolvable:$true] %s834_s15 }
  0x8b   : > { %v422_v12 = vrot.slane %v407_v11, %v421_v2  ;;  %v411_v13 = vrot.slane %v407_v11, %v410_v3  ;;  %v433_v16 = vrot.slane %v407_v11, %v432_v14  ;;  %v444_v18 = vrot.slane %v407_v11, %v443_v17  ;;  %s1231_s16 = scalar_lea.vmem %s1612_s15, 256  ;;  %s1315_s30 = smov [#allocation10]  }
  0x8c   : > { %p1232_p1 = scmp.ne.s32.totalorder %s1612_s15, %s1231_s16  ;;  %s1235_s27 = sshll.u32 %s1315_s30, 4  ;;  %s1236_s27 = int_to_ptr.vmem [resolvable:$false] %s1235_s27 }
  0x8d   : > { %424 = vbcast.lane.b32.xlu1 %v422_v12, 256  ;;  %413 = vbcast.lane.b32.xlu0 %v411_v13, 256  ;;  %s1237_s29 = scalar_lea.vmem %s1236_s27, 512  ;;  %p1238_p3 = scmp.lt.s32.totalorder %s1612_s15, %s1236_s27 }
  0x8e   : > { %1021 = vmatpush3.bf16.msra.mxu0 %v1018_v10  ;;  %p1233_p4 = pnand %p1232_p1, %p1497_p6  ;;  %p1239_p7 = scmp.lt.s32.totalorder %s1237_s29, %s1231_s16 }
  0x90   : > { %p1234_p8 = pneg %p1233_p4  ;;  %p1240_p10 = por %p1239_p7, %p1238_p3 }
  0x91   : > { %428 = vbcast.lane.b32.xlu1 %v422_v12, 264  ;;  %417 = vbcast.lane.b32.xlu0 %v411_v13, 264 }
  0x92   : > { %995 = vmatmul.mubr.msk.f32.vlgmr.msra.gmra.mrb[0].mxu0 %vm325_vm0, %v1570_v15  ;;  %p1241_p13 = pnand %p1240_p10, %p1234_p8 }
  0x95   : > { %439 = vbcast.lane.b32.xlu1 %v433_v16, 264  ;;  %435 = vbcast.lane.b32.xlu0 %v433_v16, 256 }
  0x99   : > { %450 = vbcast.lane.b32.xlu1 %v444_v18, 264  ;;  %446 = vbcast.lane.b32.xlu0 %v444_v18, 256 }
  0xff   : > { %v425_v19 = vpop.permute.xlu1 %424  ;;  %v414_v20 = vpop.permute.xlu0 %413 }
 0x100   : > { %vm454_vm5 = vcmp.ne.f32.partialorder %v425_v19, 0.0  ;;  %vm452_vm6 = vcmp.ne.f32.partialorder %v414_v20, 0.0 }
 0x103   : > { %v429_v21 = vpop.permute.xlu1 %428  ;;  %v418_v22 = vpop.permute.xlu0 %417 }
 0x104   : > { %vm455_vm7 = vcmp.ne.f32.partialorder %v429_v21, 0.0  ;;  %vm453_vm8 = vcmp.ne.f32.partialorder %v418_v22, 0.0 }
 0x107   : > { %v440_v23 = vpop.permute.xlu1 %439  ;;  %v436_v24 = vpop.permute.xlu0 %435 }
 0x108   : > { %vm457_vm1 = vcmp.ne.f32.partialorder %v440_v23, 0.0  ;;  %vm456_vm9 = vcmp.ne.f32.partialorder %v436_v24, 0.0 }
 0x10b   : > { %v451_v25 = vpop.permute.xlu1 %450  ;;  %v447_v27 = vpop.permute.xlu0 %446 }
 0x10c   : > { %vm459_vm3 = vcmp.ne.f32.partialorder %v451_v25, 0.0  ;;  %vm458_vm10 = vcmp.ne.f32.partialorder %v447_v27, 0.0 }
 0x165   : > { %v996_v28 = vpop.f32.mrb[0].mxu0 }
 0x166   : > { %v404_v29 = vadd.f32 %v996_v28, %v951_v26  ;;  %v398_v30 = vpop.f32.mrb[1].mxu0 }
 0x167   : > { %v399_v31 = vadd.f32 %v951_v26, %v398_v30 }
 0x168   : > { %v477_v32 = vsel %vm453_vm8, %v404_v29, -inf  ;;  %v479_v33 = vsel %vm455_vm7, %v404_v29, -inf  ;;  %v481_v34 = vsel %vm457_vm1, %v404_v29, -inf  ;;  %v483_v35 = vsel %vm459_vm3, %v404_v29, -inf }
 0x169   : > { %v486_v36 = vsel %vm484_vm2, %v477_v32, -inf  ;;  %v495_v37 = vsel %vm484_vm2, %v479_v33, -inf  ;;  %v504_v38 = vsel %vm484_vm2, %v481_v34, -inf  ;;  %v513_v39 = vsel %vm484_vm2, %v483_v35, -inf  ;;  %999 = vmatprep.mubr.msk.f32.mxu1 %vm533_vm4, %v399_v31  ;;  %v726_v32 = vld [vmem:[#allocation8] sm:$0xff]  ;;  %v727_v33 = vld [vmem:[#allocation8 + $0x8] sm:$0xff] }
 0x16a   : > { %v476_v40 = vsel %vm452_vm6, %v399_v31, -inf  ;;  %v478_v41 = vsel %vm454_vm5, %v399_v31, -inf  ;;  %v480_v42 = vsel %vm456_vm9, %v399_v31, -inf  ;;  %v482_v43 = vsel %vm458_vm10, %v399_v31, -inf }
 0x16b   : > { %v485_v44 = vsel %vm484_vm2, %v476_v40, -inf  ;;  %v494_v45 = vsel %vm484_vm2, %v478_v41, -inf  ;;  %v503_v46 = vsel %vm484_vm2, %v480_v42, -inf  ;;  %v512_v47 = vsel %vm484_vm2, %v482_v43, -inf }
 0x16c   : > { %v487_v48 = vmax.f32 %v485_v44, %v486_v36  ;;  %v496_v49 = vmax.f32 %v494_v45, %v495_v37  ;;  %v514_v50 = vmax.f32 %v512_v47, %v513_v39  ;;  %v505_v51 = vmax.f32 %v503_v46, %v504_v38  ;;  %v960_v44 = vld [vmem:[%s1664_s5] ss:$0 sm:$0xff] }
 0x16d   : > { %v1022_v34 = vpack.c.bf16 %v727_v33, %v726_v32 }
 0x16e   : > { %v515_v52 = vrot.slane %v514_v50, 4  ;;  %v488_v53 = vrot.slane %v487_v48, 4  ;;  %v497_v54 = vrot.slane %v496_v49, 4  ;;  %v506_v55 = vrot.slane %v505_v51, 4 }
 0x16f   : > { %1023 = vmatprep.subr.bf16.mxu0 %v1022_v34 }
 0x170   : > { %v516_v56 = vmax.f32 %v514_v50, %v515_v52  ;;  %v489_v57 = vmax.f32 %v487_v48, %v488_v53  ;;  %v498_v58 = vmax.f32 %v496_v49, %v497_v54  ;;  %v507_v59 = vmax.f32 %v505_v51, %v506_v55  ;;  %1025 = vmatpush3.bf16.msra.mxu0 %v1022_v34 }
 0x172   : > { %v517_v60 = vrot.slane %v516_v56, 2  ;;  %v490_v61 = vrot.slane %v489_v57, 2  ;;  %v499_v62 = vrot.slane %v498_v58, 2  ;;  %v508_v63 = vrot.slane %v507_v59, 2 }
 0x174   : > { %v518_v0 = vmax.f32 %v516_v56, %v517_v60  ;;  %v491_v1 = vmax.f32 %v489_v57, %v490_v61  ;;  %v500_v2 = vmax.f32 %v498_v58, %v499_v62  ;;  %v509_v3 = vmax.f32 %v507_v59, %v508_v63 }
 0x176   : > { %v492_v4 = vrot.slane %v491_v1, 1  ;;  %v501_v5 = vrot.slane %v500_v2, 1  ;;  %v510_v6 = vrot.slane %v509_v3, 1  ;;  %v519_v7 = vrot.slane %v518_v0, 1 }
 0x178   : > { %v493_v8 = vmax.f32 %v491_v1, %v492_v4  ;;  %v502_v10 = vmax.f32 %v500_v2, %v501_v5  ;;  %v511_v11 = vmax.f32 %v509_v3, %v510_v6  ;;  %v520_v12 = vmax.f32 %v518_v0, %v519_v7 }
 0x17a   : > { %v526_v13 = vsel %vm525_vm11, %v502_v10, %v493_v8 }
 0x17b   : > { %v528_v14 = vsel %vm527_vm12, %v511_v11, %v526_v13 }
 0x17c   : > { %v530_v16 = vsel %vm529_vm13, %v520_v12, %v528_v14 }
 0x17d   : > { %531 = vrot.lane.b32.xlu0 %v530_v16, %s1313_s20 }
 0x1ef   : > { %v532_v17 = vpop.permute.xlu0 %531 }
 0x1f0   : > { %997 = vmatprep.subr.msk.mxu1 %vm533_vm4, %v532_v17 }
 0x1f1   : > { %998 = vmatpush3.xpose.msk.msra.mxu1 %vm533_vm4, %v532_v17 }
 0x1f4   : > { %1000 = vmatmul.mubr.msk.f32.vlgmr.msra.gmra.mrb[0].mxu1 %vm533_vm4, %v404_v29 }
 0x2c7   : > { %v1001_v18 = vpop.f32.mrb[0].mxu1 }
 0x2c8   : > { %v608_v19 = vpop.f32.mrb[1].mxu1  ;;  %v621_v20 = vsel %vm617_vm14, %v1001_v18, -inf }
 0x2c9   : > { %622 = vmax.xlane.f32.xlu0 %v621_v20  ;;  %v618_v21 = vsel %vm617_vm14, %v608_v19, -inf }
 0x2ca   : > { %619 = vmax.xlane.f32.xlu1 %v618_v21 }
 0x356   : > { %v623_v22 = vpop.xlane.xlu0 %622 }
 0x357   : > { %v625_v23 = vsub.f32 %v1001_v18, %v623_v22  ;;  %v620_v24 = vpop.xlane.xlu1 %619 }
 0x358   : > { %v624_v25 = vsub.f32 %v608_v19, %v620_v24 }
 0x359   : > { %v628_v26 = vmul.f32 1.442695, %v625_v23 }
 0x35a   : > { %v626_v27 = vmul.f32 1.442695, %v624_v25 }
 0x35b   : > { %1109 = vpow2.f32 %v628_v26 }
 0x35c   : > { %1111 = vpow2.f32 %v626_v27 }
 0x365   : > { %v1110_v28 = vpop.eup %1109 }
 0x366   : > { %v1112_v30 = vpop.eup %1111  ;;  %v633_v29 = vsel %vm617_vm14, %v1110_v28, 0.0 }
 0x367   : > { %634 = vadd.xlane.f32.xlu1 %v633_v29  ;;  %v630_v31 = vsel %vm617_vm14, %v1112_v30, 0.0 }
 0x368   : > { %631 = vadd.xlane.f32.xlu0 %v630_v31 }
 0x37e   : > { %640 = vrot.lane.b32.xlu0 %v530_v16, %s1314_s26 }
 0x3f4   : > { %v635_v35 = vpop.xlane.xlu1 %634 }
 0x3f5   : > { %1113 = vrcp.f32 %v635_v35  ;;  %v632_v36 = vpop.xlane.xlu0 %631 }
 0x3f6   : > { %1115 = vrcp.f32 %v632_v36 }
 0x3f9   : > { %v641_v37 = vpop.permute.xlu0 %640 }
 0x3fa   : > { %1002 = vmatprep.subr.msk.mxu1 %vm648_vm15, %v641_v37 }
 0x3fb   : > { %1003 = vmatpush3.msk.msra.mxu1 %vm648_vm15, %v641_v37 }
 0x3ff   : > { %v1114_v38 = vpop.eup %1113 }
 0x400   : > { %v1116_v39 = vpop.eup %1115  ;;  %v639_v41 = vmul.f32 %v1114_v38, %v1110_v28 }
 0x401   : > { %v638_v40 = vmul.f32 %v1116_v39, %v1112_v30 }
 0x403   : > { %1004 = vmatprep.mubr.msk.f32.mxu1 %vm617_vm14, %v638_v40 }
 0x404   : > { %1005 = vmatmul.mubr.msk.f32.vlgmr.msra.gmra.mrb[2].mxu1 %vm617_vm14, %v639_v41 }
 0x4d7   : > { %v1006_v42 = vpop.f32.mrb[2].mxu1 }
 0x4d8   : > { %v717_v43 = vpop.f32.mrb[3].mxu1 }
 0x4d9   : > { %1011 = vmatprep.mubr.msk.f32.mxu0 %vm533_vm4, %v717_v43 }
 0x4da   : > { %1012 = vmatmul.mubr.msk.f32.vlgmr.msra.gmra.mrb[2].mxu0 %vm533_vm4, %v1006_v42 }
 0x5ad   : > { %v1013_v45 = vpop.f32.mrb[2].mxu0 }
 0x5ae   : > { %v813_v46 = vadd.f32 %v1013_v45, %v960_v44  ;;  %v807_v47 = vpop.f32.mrb[3].mxu0 }
 0x5af   : > { %v808_v48 = vadd.f32 %v960_v44, %v807_v47 }
 0x5b0   : > { %v817_v49 = vadd.f32 %v813_v46, %v1570_v15 }
 0x5b1   : > { %v816_v50 = vadd.f32 %v808_v48, %v1566_v9 }
 0x5b2   : > { %819 = vst.msk [vmem:[%s311_s14 + $0x8] sm:$0xff] %vm325_vm0, %v817_v49 }
 0x5b3   : > { %818 = vst.msk [vmem:[%s311_s14] sm:$0xff] %vm325_vm0, %v816_v50 }
 0x5b4   : > { %1244 = shalt.err (!%p1241_p13)
}
 0x5b5   : > { %s1245_s20 = scalar_lea.hbm %s1610_s7, 256  ;;  %s1249_s9 = scalar_lea.hbm %s1665_s6, 512 }
 0x5b6   : > { %p1246_p0 = scmp.ne.s32.totalorder %s1610_s7, %s1245_s20  ;;  %p1250_p9 = scmp.lt.u32.totalorder %s1610_s7, %s1665_s6 }
 0x5b7   : > { %p1251_p12 = scmp.lt.u32.totalorder %s1249_s9, %s1245_s20  ;;  %p1253_p1 = scmp.lt.u32.totalorder %s1245_s20, %s1610_s7 }
 0x5b8   : > { %p1247_p5 = pnand %p1246_p0, %p1497_p6 }
 0x5b9   : > { %p1252_p2 = por %p1251_p12, %p1250_p9 }
 0x5ba   : > { %p1248_p11 = pneg %p1247_p5 }
 0x5bb   : > { %p1254_p4 = por %p1253_p1, %p1252_p2 }
 0x5bd   : > { %p1255_p8 = pnand %p1254_p4, %p1248_p11 }
 0x5bf   : > { %1258 = shalt.err (!%p1255_p8)
}
 0x5c0   : > { %s1316_s12 = smov 128   ;;  %s1317_s17 = smov 8  }
 0x5c1   : > { %1040 = dma.vmem_to_hbm [thread:$0]  (%p1497_p6), %s1612_s15, 256, %s1610_s7, %s821_s25, %s1316_s12, %s1316_s12, %s1317_s17  }
 0x5c2 PF: > { %s849_s16 = sand.u32 1, %s1293_s21   ;;  %p1683_p3 = scmp.ne.s32.totalorder %s1670_s28, 0 }
 0x5c3   : > { %p1684_p7 = scmp.ge.s32.totalorder %s1305_s24, 2  ;;  %s850_s30 = scalar_lea.sflag [#allocation4], %s849_s16 }
 0x5c5   : > { %p1057_p10 = pnand %p1684_p7, %p1683_p3 }
 0x5c7   : > { %1288 = dma.done.wait (!%p1057_p10), %s850_s30, 256  }
 0x5c8   : > { %1290 = vsyncadd (!%p1057_p10), %s850_s30, 4294967040  ;;  %p21_p13 = scmp.ge.s32.totalorder %s1483_s18, 4   ;;  %s1685_s21 = smov %s1297_s22 }
 0x5c9   : > { %s1686_s22 = smov %s1301_s23  ;;  %s1687_s23 = smov %s1493_s11 }
 0x5ca   : > { %s1688_s24 = smov %s1483_s18  ;;  %23 = sbr.rel (!%p21_p13) target bundleno = 7 (0x7), region = 101 }
 0x5d1   :  { %855 = vsyncpa [#allocation3], 1 }
 0x5d2   :  { %857 = vsyncpa [#allocation3 + $0x1], 1 }
 0x5d3   :  { %858 = vsyncpa [#allocation6], 1 }
 0x5d4   :  { %859 = vsyncpa [#allocation9], 1 }
 0x5d5   :  { %860 = vsyncpa [#allocation4], 1 }
 0x5d6   :  { %862 = vsyncpa [#allocation4 + $0x1], 1 }

</bundles_post_ra>
